<compile_context>
chip_gen: v7x
topology: tpu7x:2x2x1
jax: 0.10.0
libtpu: 0.0.40
codegen_flags: <defaults>
</compile_context>

<pallas_src>
import functools

import jax
import jax.numpy as jnp
from jax.experimental import pallas as pl
from jax.experimental.pallas import tpu as pltpu

_BN_EPS = 1e-5
_LANE = 128
_SUBLANE = 8


def _round_up(x, m):
    return (x + m - 1) // m * m


# ----------------------------------------------------------------------------
# Pallas kernel: the entire MLP forward, fused, two operands total
# ----------------------------------------------------------------------------
def _fused_mlp_kernel(n_layers, x_ref, w_ref, out_ref):
    """x_ref: (B_pad, P) activations with lane P-1 == 1.0 (bias lane).
    w_ref: (n_layers, P, P) folded-BN weight slab with bias in row P-1.
    out_ref: (B_pad, P) lane-dense output."""
    h = x_ref[...]
    for i in range(n_layers):                                  # unrolled at trace time
        z = jnp.dot(h, w_ref[i], preferred_element_type=jnp.float32)
        h = jnp.maximum(z, 0.0) if i < n_layers - 1 else z     # ReLU on hidden layers only
        # (lane P-1 stays at 1.0 through hidden layers: W[P-1, P-1] = 1, ReLU(1) = 1)
    out_ref[...] = h


# ----------------------------------------------------------------------------
# Wrapper (single pallas_call for the whole forward)
# ----------------------------------------------------------------------------
def vanilla_regression_forward(params, x, feature, attention_sig=0):
    """Matches vanilla_regression.forward: only `feature` is used."""
    del x, attention_sig  # unused by the PyTorch forward
    B = feature.shape[0]
    feat = feature.reshape(B, -1).astype(jnp.float32)
    feature_dim = feat.shape[1]

    hidden = params["hidden"]
    n_layers = len(hidden) + 1
    num_classes = params["out"]["w"].shape[1]
    hidden_dim = hidden[0]["w"].shape[1] if hidden else feature_dim

    # Padded width: room for the widest layer plus one constant-1 "bias lane".
    P = _round_up(max(feature_dim, hidden_dim, num_classes) + 1, _LANE)
    bias_row = P - 1
    B_pad = _round_up(B, _SUBLANE)

    # ---- One constant-folded, zero-padded weight slab (n_layers, P, P). -----
    # Eval-mode BatchNorm1d is an exact affine transform, folded into the
    # preceding Linear:
    #   y = ((x@W + b) - mean)/sqrt(var+eps)*gamma + beta
    #     =  x @ (W*s) + ((b-mean)*s + beta),  s = gamma/sqrt(var+eps)
    # The folded bias lives in row P-1 of the weight slab (lane P-1 of h is 1).
    # Under jit, params are closed-over constants, so this padding/folding is
    # constant-folded at compile time — zero runtime cost.
    # TODO(synk): BatchNorm1d training-mode (batch-statistics) normalization is
    # not implemented; this is the inference-mode (running stats) forward.
    slabs = []
    for lp in hidden:
        s = lp["gamma"] * jax.lax.rsqrt(lp["var"] + _BN_EPS)       # (1, H)
        w = lp["w"] * s                                            # (in, H)
        b = (lp["b"] - lp["mean"]) * s + lp["beta"]                # (1, H)
        in_dim, out_dim = w.shape
        slab = jnp.zeros((P, P), jnp.float32)
        slab = slab.at[:in_dim, :out_dim].set(w)
        slab = slab.at[bias_row, :out_dim].set(b[0])
        slab = slab.at[bias_row, bias_row].set(1.0)   # keep the constant-1 lane alive
        slabs.append(slab)
    w_out, b_out = params["out"]["w"], params["out"]["b"]
    in_dim, out_dim = w_out.shape
    slab = jnp.zeros((P, P), jnp.float32)
    slab = slab.at[:in_dim, :out_dim].set(w_out)
    slab = slab.at[bias_row, :out_dim].set(b_out[0])
    slabs.append(slab)
    w_slab = jnp.stack(slabs)                                      # (n_layers, P, P)

    # ---- Lane-dense, sublane-padded activations: (B_pad, P); lane P-1 = 1. --
    h0 = jnp.zeros((B_pad, P), jnp.float32)
    h0 = h0.at[:B, :feature_dim].set(feat)
    h0 = h0.at[:, bias_row].set(1.0)

    vmem = pl.BlockSpec(memory_space=pltpu.MemorySpace.VMEM)       # whole array in VMEM
    out_pad = pl.pallas_call(
        functools.partial(_fused_mlp_kernel, n_layers),
        in_specs=[vmem, vmem],
        out_specs=vmem,
        out_shape=jax.ShapeDtypeStruct((B_pad, P), jnp.float32),
    )(h0, w_slab)
    return out_pad[:B, :num_classes]


# ----------------------------------------------------------------------------
# Synthetic parameters (mirror Linear + BatchNorm1d weights/buffers)
# ----------------------------------------------------------------------------
def init_params(key, feature_dim=10, hidden_dim=64, num_classes=10, n_layers=5):
    params = {"hidden": [], "out": {}}
    keys = jax.random.split(key, 6 * (n_layers - 1) + 2)
    ki = 0
    in_dim = feature_dim
    for _ in range(n_layers - 1):
        scale = (1.0 / in_dim) ** 0.5
        layer = {
            "w": scale * jax.random.normal(keys[ki], (in_dim, hidden_dim), jnp.float32),
            "b": 0.05 * jax.random.normal(keys[ki + 1], (1, hidden_dim), jnp.float32),
            "gamma": 1.0 + 0.1 * jax.random.normal(keys[ki + 2], (1, hidden_dim), jnp.float32),
            "beta": 0.1 * jax.random.normal(keys[ki + 3], (1, hidden_dim), jnp.float32),
            "mean": 0.1 * jax.random.normal(keys[ki + 4], (1, hidden_dim), jnp.float32),
            "var": 1.0 + 0.5 * jax.random.uniform(keys[ki + 5], (1, hidden_dim), jnp.float32),
        }
        ki += 6
        params["hidden"].append(layer)
        in_dim = hidden_dim
    scale = (1.0 / in_dim) ** 0.5
    params["out"]["w"] = scale * jax.random.normal(keys[ki], (in_dim, num_classes), jnp.float32)
    params["out"]["b"] = 0.05 * jax.random.normal(keys[ki + 1], (1, num_classes), jnp.float32)
    return params


# Pure-JAX reference (un-folded, layer-by-layer) for a correctness check.
def _reference_forward(params, feature):
    h = feature.reshape(feature.shape[0], -1)
    for lp in params["hidden"]:
        z = h @ lp["w"] + lp["b"]
        z = (z - lp["mean"]) / jnp.sqrt(lp["var"] + _BN_EPS)
        h = jnp.maximum(z * lp["gamma"] + lp["beta"], 0.0)
    return h @ params["out"]["w"] + params["out"]["b"]


# ----------------------------------------------------------------------------
if __name__ == "__main__":
    B, INPUT_DIM, FEATURE_DIM, HIDDEN_DIM, NUM_CLASSES, N_LAYERS = 4, 50, 10, 64, 10, 5
    key = jax.random.PRNGKey(0)
    kp, kx, kf = jax.random.split(key, 3)
    params = init_params(kp, FEATURE_DIM, HIDDEN_DIM, NUM_CLASSES, N_LAYERS)

    x = jax.random.normal(kx, (B, INPUT_DIM), jnp.float32)     # unused (matches PyTorch forward)
    feature = jax.random.normal(kf, (B, FEATURE_DIM), jnp.float32)

    fwd = jax.jit(functools.partial(vanilla_regression_forward, params))
    out = fwd(x, feature)
    jax.block_until_ready(out)

    ref = _reference_forward(params, feature)
    assert out.shape == (B, NUM_CLASSES)
    # NOTE: tolerance reflects default (bf16-pass) MXU precision for f32 matmuls,
    # used identically by the XLA reference.
    max_err = float(jnp.max(jnp.abs(out - ref)))
    assert max_err < 5e-2, f"kernel vs reference mismatch: max abs err {max_err}"
    print("KERNEL_OK")
</pallas_src>

<mosaic_0001>
module attributes {stable_mosaic.version = 11 : i64} {
  func.func @_fused_mlp_kernel(%arg0: memref<8x128xf32, #tpu.memory_space<vmem>>, %arg1: memref<5x128x128xf32, #tpu.memory_space<vmem>>, %arg2: memref<8x128xf32, #tpu.memory_space<vmem>>) attributes {dimension_semantics = [], scalar_prefetch = 0 : i64, scratch_operands = 0 : i64, tpu.core_type = #tpu.core_type<tc>} {
    %c0 = arith.constant 0 : index
    %c0_0 = arith.constant 0 : index
    %0 = vector.load %arg0[%c0, %c0_0] : memref<8x128xf32, #tpu.memory_space<vmem>>, vector<8x128xf32>
    %c0_1 = arith.constant 0 : index
    %c0_2 = arith.constant 0 : index
    %c0_3 = arith.constant 0 : index
    %1 = vector.load %arg1[%c0_1, %c0_2, %c0_3] : memref<5x128x128xf32, #tpu.memory_space<vmem>>, vector<1x128x128xf32>
    %2 = vector.shape_cast %1 : vector<1x128x128xf32> to vector<128x128xf32>
    %cst = arith.constant dense<0.000000e+00> : vector<8x128xf32>
    %3 = tpu.matmul %0, %2, %cst {dimension_numbers = #tpu.dot_dimension_numbers<[1], [0], [0], [1], [0, 0, 1, 1], [], []>} : vector<8x128xf32>, vector<128x128xf32>, vector<8x128xf32> -> vector<8x128xf32>
    %cst_4 = arith.constant 0.000000e+00 : f32
    %4 = vector.broadcast %cst_4 : f32 to vector<8x128xf32>
    %5 = arith.maximumf %3, %4 : vector<8x128xf32>
    %c1 = arith.constant 1 : index
    %c0_5 = arith.constant 0 : index
    %c0_6 = arith.constant 0 : index
    %6 = vector.load %arg1[%c1, %c0_5, %c0_6] : memref<5x128x128xf32, #tpu.memory_space<vmem>>, vector<1x128x128xf32>
    %7 = vector.shape_cast %6 : vector<1x128x128xf32> to vector<128x128xf32>
    %cst_7 = arith.constant dense<0.000000e+00> : vector<8x128xf32>
    %8 = tpu.matmul %5, %7, %cst_7 {dimension_numbers = #tpu.dot_dimension_numbers<[1], [0], [0], [1], [0, 0, 1, 1], [], []>} : vector<8x128xf32>, vector<128x128xf32>, vector<8x128xf32> -> vector<8x128xf32>
    %cst_8 = arith.constant 0.000000e+00 : f32
    %9 = vector.broadcast %cst_8 : f32 to vector<8x128xf32>
    %10 = arith.maximumf %8, %9 : vector<8x128xf32>
    %c2 = arith.constant 2 : index
    %c0_9 = arith.constant 0 : index
    %c0_10 = arith.constant 0 : index
    %11 = vector.load %arg1[%c2, %c0_9, %c0_10] : memref<5x128x128xf32, #tpu.memory_space<vmem>>, vector<1x128x128xf32>
    %12 = vector.shape_cast %11 : vector<1x128x128xf32> to vector<128x128xf32>
    %cst_11 = arith.constant dense<0.000000e+00> : vector<8x128xf32>
    %13 = tpu.matmul %10, %12, %cst_11 {dimension_numbers = #tpu.dot_dimension_numbers<[1], [0], [0], [1], [0, 0, 1, 1], [], []>} : vector<8x128xf32>, vector<128x128xf32>, vector<8x128xf32> -> vector<8x128xf32>
    %cst_12 = arith.constant 0.000000e+00 : f32
    %14 = vector.broadcast %cst_12 : f32 to vector<8x128xf32>
    %15 = arith.maximumf %13, %14 : vector<8x128xf32>
    %c3 = arith.constant 3 : index
    %c0_13 = arith.constant 0 : index
    %c0_14 = arith.constant 0 : index
    %16 = vector.load %arg1[%c3, %c0_13, %c0_14] : memref<5x128x128xf32, #tpu.memory_space<vmem>>, vector<1x128x128xf32>
    %17 = vector.shape_cast %16 : vector<1x128x128xf32> to vector<128x128xf32>
    %cst_15 = arith.constant dense<0.000000e+00> : vector<8x128xf32>
    %18 = tpu.matmul %15, %17, %cst_15 {dimension_numbers = #tpu.dot_dimension_numbers<[1], [0], [0], [1], [0, 0, 1, 1], [], []>} : vector<8x128xf32>, vector<128x128xf32>, vector<8x128xf32> -> vector<8x128xf32>
    %cst_16 = arith.constant 0.000000e+00 : f32
    %19 = vector.broadcast %cst_16 : f32 to vector<8x128xf32>
    %20 = arith.maximumf %18, %19 : vector<8x128xf32>
    %c4 = arith.constant 4 : index
    %c0_17 = arith.constant 0 : index
    %c0_18 = arith.constant 0 : index
    %21 = vector.load %arg1[%c4, %c0_17, %c0_18] : memref<5x128x128xf32, #tpu.memory_space<vmem>>, vector<1x128x128xf32>
    %22 = vector.shape_cast %21 : vector<1x128x128xf32> to vector<128x128xf32>
    %cst_19 = arith.constant dense<0.000000e+00> : vector<8x128xf32>
    %23 = tpu.matmul %20, %22, %cst_19 {dimension_numbers = #tpu.dot_dimension_numbers<[1], [0], [0], [1], [0, 0, 1, 1], [], []>} : vector<8x128xf32>, vector<128x128xf32>, vector<8x128xf32> -> vector<8x128xf32>
    %c0_20 = arith.constant 0 : index
    %c0_21 = arith.constant 0 : index
    %24 = vector.load %arg2[%c0_20, %c0_21] : memref<8x128xf32, #tpu.memory_space<vmem>>, vector<8x128xf32>
    tpu.vector_store %arg2[%c0_20, %c0_21], %23 {strides = array<i32>} : memref<8x128xf32, #tpu.memory_space<vmem>>, vector<8x128xf32>,
    return
  }
}

</mosaic_0001>

<bundles_post_ra>
// kernel: vanilla_regression_forward.1
= control target key start
LH: loop header
LB: loop body
LE: loop exit
PB: predicated region body
PF: predicated region fallthrough
CT: control target
= control target key end

     0   :  { %7 = vsyncpa [#allocation3], 0  ;;  %s880_s9 = smov [#allocation2]   ;;  %s969_s0 = inlined_call_operand.vmem [shape: f32[8,128], index: 0, kind: input, shape index: {}]   ;;  %s970_s1 = inlined_call_operand.hbm [shape: f32[5,128,128], index: 1, kind: input, shape index: {}]   ;;  %s971_s2 = inlined_call_operand.vmem [shape: f32[8,128], index: 2, kind: output, shape index: {}]  }
   0x1   :  { %s15_s10 = sshll.u32 %s880_s9, 4  ;;  %s856_s13 = scalar_lea.hbm %s970_s1, 10240  ;;  %s16_s10 = int_to_ptr.vmem [resolvable:$true] %s15_s10 }
   0x2   :  { %p857_p0 = scmp.ne.s32.totalorder %s970_s1, %s856_s13  ;;  %p860_p1 = scmp.lt.u32.totalorder %s856_s13, %s970_s1 }
   0x4   :  { %p862_p2 = pnand %p860_p1, %p857_p0 }
   0x6   :  { %865 = shalt.err (!%p862_p2)
}
   0x7   :  { %s866_s18 = scalar_lea.vmem %s16_s10, 10240  ;;  %p871_p4 = scmp.lt.s32.totalorder %s16_s10, %s16_s10 }
   0x8   :  { %p867_p3 = scmp.ne.s32.totalorder %s16_s10, %s866_s18  ;;  %p872_p5 = scmp.lt.s32.totalorder %s866_s18, %s866_s18 }
   0xa   :  { %p873_p6 = por %p872_p5, %p871_p4 }
   0xc   :  { %p874_p7 = pnand %p873_p6, %p867_p3 }
   0xe   :  { %877 = shalt.err (!%p874_p7)
}
   0xf   :  { %s881_s19 = smov 128   ;;  %s882_s20 = smov 8  }
  0x10   :  { %21 = dma.hbm_to_vmem [thread:$0]  %s970_s1, 10240, %s16_s10, [#allocation3], %s881_s19, %s881_s19, %s882_s20  }
  0x11   :  { %878 = dma.done.wait [#allocation3], 10240  }
  0x12   :  { %879 = vsyncadd [#allocation3], 4294957056  ;;  %v883_v0 = vmov 0.0|0.0   ;;  %vm884_vm0 = vmmov 0   ;;  %v885_v1 = vmov 0.0   ;;  %v26_v2 = vld [vmem:[#allocation2] sm:$0xff] }
  0x13   :  { %730 = vmatprep.subr.bf16.mxu0 %v883_v0  ;;  %587 = vmatprep.mubr.msk.f32.mxu0 %vm884_vm0, %v885_v1  ;;  %v27_v3 = vld [vmem:[#allocation2 + $0x8] sm:$0xff]  ;;  %v28_v4 = vld [vmem:[#allocation2 + $0x10] sm:$0xff]  ;;  %v29_v6 = vld [vmem:[#allocation2 + $0x18] sm:$0xff] }
  0x14   :  { %754 = vmatprep.subr.bf16.mxu1 %v883_v0  ;;  %622 = vmatprep.mubr.msk.f32.mxu1 %vm884_vm0, %v885_v1  ;;  %v731_v5 = vpack.c.bf16 %v27_v3, %v26_v2  ;;  %v734_v7 = vpack.c.bf16 %v29_v6, %v28_v4  ;;  %v30_v8 = vld [vmem:[#allocation2 + $0x20] sm:$0xff]  ;;  %v31_v9 = vld [vmem:[#allocation2 + $0x28] sm:$0xff]  ;;  %v116_v12 = vld [vmem:[#allocation2 + $0x90] sm:$0xff] }
  0x15   :  { %v114_v10 = vld [vmem:[#allocation2 + $0x80] sm:$0xff]  ;;  %v115_v11 = vld [vmem:[#allocation2 + $0x88] sm:$0xff]  ;;  %v117_v13 = vld [vmem:[#allocation2 + $0x98] sm:$0xff]  ;;  %v737_v14 = vpack.c.bf16 %v31_v9, %v30_v8 }
  0x16   :  { %732 = vmatpush3.bf16.msra.mxu0 %v731_v5  ;;  %v755_v15 = vpack.c.bf16 %v115_v11, %v114_v10  ;;  %v32_v16 = vld [vmem:[#allocation2 + $0x30] sm:$0xff]  ;;  %v33_v17 = vld [vmem:[#allocation2 + $0x38] sm:$0xff]  ;;  %v758_v18 = vpack.c.bf16 %v117_v13, %v116_v12  ;;  %v118_v19 = vld [vmem:[#allocation2 + $0xa0] sm:$0xff] }
  0x17   :  { %733 = vmatprep.subr.bf16.mxu0 %v883_v0  ;;  %v119_v20 = vld [vmem:[#allocation2 + $0xa8] sm:$0xff]  ;;  %v740_v21 = vpack.c.bf16 %v33_v17, %v32_v16  ;;  %v34_v22 = vld [vmem:[#allocation2 + $0x40] sm:$0xff]  ;;  %v120_v25 = vld [vmem:[#allocation2 + $0xb0] sm:$0xff] }
  0x18   :  { %756 = vmatpush3.bf16.msra.mxu1 %v755_v15  ;;  %v35_v23 = vld [vmem:[#allocation2 + $0x48] sm:$0xff]  ;;  %v761_v24 = vpack.c.bf16 %v119_v20, %v118_v19  ;;  %v121_v26 = vld [vmem:[#allocation2 + $0xb8] sm:$0xff]  ;;  %v36_v28 = vld [vmem:[#allocation2 + $0x50] sm:$0xff] }
  0x19   :  { %757 = vmatprep.subr.bf16.mxu1 %v883_v0  ;;  %v743_v27 = vpack.c.bf16 %v35_v23, %v34_v22  ;;  %v37_v29 = vld [vmem:[#allocation2 + $0x58] sm:$0xff]  ;;  %v764_v30 = vpack.c.bf16 %v121_v26, %v120_v25  ;;  %v122_v31 = vld [vmem:[#allocation2 + $0xc0] sm:$0xff]  ;;  %v123_v32 = vld [vmem:[#allocation2 + $0xc8] sm:$0xff] }
  0x1a   :  { %735 = vmatpush3.bf16.msra.mxu0 %v734_v7  ;;  %v746_v33 = vpack.c.bf16 %v37_v29, %v36_v28  ;;  %v38_v34 = vld [vmem:[#allocation2 + $0x60] sm:$0xff]  ;;  %v39_v35 = vld [vmem:[#allocation2 + $0x68] sm:$0xff]  ;;  %v767_v36 = vpack.c.bf16 %v123_v32, %v122_v31  ;;  %v124_v37 = vld [vmem:[#allocation2 + $0xd0] sm:$0xff] }
  0x1b   :  { %736 = vmatprep.subr.bf16.mxu0 %v883_v0  ;;  %v125_v38 = vld [vmem:[#allocation2 + $0xd8] sm:$0xff]  ;;  %v749_v39 = vpack.c.bf16 %v39_v35, %v38_v34  ;;  %v40_v40 = vld [vmem:[#allocation2 + $0x70] sm:$0xff]  ;;  %v126_v43 = vld [vmem:[#allocation2 + $0xe0] sm:$0xff] }
  0x1c   :  { %759 = vmatpush3.bf16.msra.mxu1 %v758_v18  ;;  %v41_v41 = vld [vmem:[#allocation2 + $0x78] sm:$0xff]  ;;  %v770_v42 = vpack.c.bf16 %v125_v38, %v124_v37  ;;  %v127_v44 = vld [vmem:[#allocation2 + $0xe8] sm:$0xff]  ;;  %v128_v48 = vld [vmem:[#allocation2 + $0xf0] sm:$0xff] }
  0x1d   :  { %760 = vmatprep.subr.bf16.mxu1 %v883_v0  ;;  %v752_v45 = vpack.c.bf16 %v41_v41, %v40_v40  ;;  %v773_v46 = vpack.c.bf16 %v127_v44, %v126_v43  ;;  %v25_v47 = vld [vmem:[%s969_s0] sm:$0xff]  ;;  %v202_v51 = vld [vmem:[#allocation2 + $0x100] sm:$0xff]  ;;  %v203_v52 = vld [vmem:[#allocation2 + $0x108] sm:$0xff] }
  0x1e   :  { %738 = vmatpush3.bf16.msra.mxu0 %v737_v14  ;;  %v129_v49 = vld [vmem:[#allocation2 + $0xf8] sm:$0xff]  ;;  %v204_v53 = vld [vmem:[#allocation2 + $0x110] sm:$0xff]  ;;  %v779_v54 = vpack.c.bf16 %v203_v52, %v202_v51  ;;  %v206_v57 = vld [vmem:[#allocation2 + $0x120] sm:$0xff] }
  0x1f   :  { %739 = vmatprep.subr.bf16.mxu0 %v883_v0  ;;  %v776_v50 = vpack.c.bf16 %v129_v49, %v128_v48  ;;  %v205_v55 = vld [vmem:[#allocation2 + $0x118] sm:$0xff]  ;;  %v207_v58 = vld [vmem:[#allocation2 + $0x128] sm:$0xff]  ;;  %v208_v60 = vld [vmem:[#allocation2 + $0x130] sm:$0xff] }
  0x20   :  { %762 = vmatpush3.bf16.msra.mxu1 %v761_v24  ;;  %v782_v56 = vpack.c.bf16 %v205_v55, %v204_v53  ;;  %v785_v59 = vpack.c.bf16 %v207_v58, %v206_v57  ;;  %v209_v61 = vld [vmem:[#allocation2 + $0x138] sm:$0xff]  ;;  %v210_v63 = vld [vmem:[#allocation2 + $0x140] sm:$0xff]  ;;  %v211_v2 = vld [vmem:[#allocation2 + $0x148] sm:$0xff] }
  0x21   :  { %763 = vmatprep.subr.bf16.mxu1 %v883_v0  ;;  %v788_v62 = vpack.c.bf16 %v209_v61, %v208_v60  ;;  %v791_v3 = vpack.c.bf16 %v211_v2, %v210_v63  ;;  %v212_v4 = vld [vmem:[#allocation2 + $0x150] sm:$0xff]  ;;  %v213_v5 = vld [vmem:[#allocation2 + $0x158] sm:$0xff]  ;;  %v214_v7 = vld [vmem:[#allocation2 + $0x160] sm:$0xff] }
  0x22   :  { %741 = vmatpush3.bf16.msra.mxu0 %v740_v21  ;;  %v794_v6 = vpack.c.bf16 %v213_v5, %v212_v4  ;;  %v215_v8 = vld [vmem:[#allocation2 + $0x168] sm:$0xff]  ;;  %v216_v13 = vld [vmem:[#allocation2 + $0x170] sm:$0xff]  ;;  %v217_v14 = vld [vmem:[#allocation2 + $0x178] sm:$0xff] }
  0x23   :  { %742 = vmatprep.subr.bf16.mxu0 %v883_v0  ;;  %v797_v9 = vpack.c.bf16 %v215_v8, %v214_v7  ;;  %v800_v15 = vpack.c.bf16 %v217_v14, %v216_v13  ;;  %v290_v16 = vld [vmem:[#allocation2 + $0x180] sm:$0xff]  ;;  %v291_v17 = vld [vmem:[#allocation2 + $0x188] sm:$0xff]  ;;  %v292_v18 = vld [vmem:[#allocation2 + $0x190] sm:$0xff] }
  0x24   :  { %765 = vmatpush3.bf16.msra.mxu1 %v764_v30  ;;  %v803_v19 = vpack.c.bf16 %v291_v17, %v290_v16  ;;  %v293_v20 = vld [vmem:[#allocation2 + $0x198] sm:$0xff]  ;;  %v294_v22 = vld [vmem:[#allocation2 + $0x1a0] sm:$0xff]  ;;  %v295_v23 = vld [vmem:[#allocation2 + $0x1a8] sm:$0xff] }
  0x25   :  { %766 = vmatprep.subr.bf16.mxu1 %v883_v0  ;;  %v806_v21 = vpack.c.bf16 %v293_v20, %v292_v18  ;;  %v809_v24 = vpack.c.bf16 %v295_v23, %v294_v22  ;;  %v296_v25 = vld [vmem:[#allocation2 + $0x1b0] sm:$0xff]  ;;  %v297_v26 = vld [vmem:[#allocation2 + $0x1b8] sm:$0xff]  ;;  %v298_v28 = vld [vmem:[#allocation2 + $0x1c0] sm:$0xff] }
  0x26   :  { %744 = vmatpush3.bf16.msra.mxu0 %v743_v27  ;;  %v812_v27 = vpack.c.bf16 %v297_v26, %v296_v25  ;;  %v299_v29 = vld [vmem:[#allocation2 + $0x1c8] sm:$0xff]  ;;  %v300_v31 = vld [vmem:[#allocation2 + $0x1d0] sm:$0xff]  ;;  %v301_v32 = vld [vmem:[#allocation2 + $0x1d8] sm:$0xff] }
  0x27   :  { %745 = vmatprep.subr.bf16.mxu0 %v883_v0  ;;  %v815_v30 = vpack.c.bf16 %v299_v29, %v298_v28  ;;  %v302_v34 = vld [vmem:[#allocation2 + $0x1e0] sm:$0xff]  ;;  %v303_v35 = vld [vmem:[#allocation2 + $0x1e8] sm:$0xff]  ;;  %v304_v40 = vld [vmem:[#allocation2 + $0x1f0] sm:$0xff] }
  0x28   :  { %768 = vmatpush3.bf16.msra.mxu1 %v767_v36  ;;  %v821_v36 = vpack.c.bf16 %v303_v35, %v302_v34  ;;  %v305_v41 = vld [vmem:[#allocation2 + $0x1f8] sm:$0xff]  ;;  %v378_v43 = vld [vmem:[#allocation2 + $0x200] sm:$0xff]  ;;  %v379_v44 = vld [vmem:[#allocation2 + $0x208] sm:$0xff] }
  0x29   :  { %769 = vmatprep.subr.bf16.mxu1 %v883_v0  ;;  %v382_v49 = vld [vmem:[#allocation2 + $0x220] sm:$0xff]  ;;  %v385_v52 = vld [vmem:[#allocation2 + $0x238] sm:$0xff]  ;;  %v387_v55 = vld [vmem:[#allocation2 + $0x248] sm:$0xff] }
  0x2a   :  { %747 = vmatpush3.bf16.msra.mxu0 %v746_v33  ;;  %v818_v33 = vpack.c.bf16 %v301_v32, %v300_v31  ;;  %v388_v57 = vld [vmem:[#allocation2 + $0x250] sm:$0xff]  ;;  %v389_v58 = vld [vmem:[#allocation2 + $0x258] sm:$0xff]  ;;  %v390_v60 = vld [vmem:[#allocation2 + $0x260] sm:$0xff] }
  0x2b   :  { %748 = vmatprep.subr.bf16.mxu0 %v883_v0  ;;  %v391_v61 = vld [vmem:[#allocation2 + $0x268] sm:$0xff]  ;;  %v392_v4 = vld [vmem:[#allocation2 + $0x270] sm:$0xff]  ;;  %v393_v5 = vld [vmem:[#allocation2 + $0x278] sm:$0xff] }
  0x2c   :  { %771 = vmatpush3.bf16.msra.mxu1 %v770_v42  ;;  %v824_v42 = vpack.c.bf16 %v305_v41, %v304_v40 }
  0x2d   :  { %772 = vmatprep.subr.bf16.mxu1 %v883_v0 }
  0x2e   :  { %750 = vmatpush3.bf16.msra.mxu0 %v749_v39 }
  0x2f   :  { %751 = vmatprep.subr.bf16.mxu0 %v883_v0 }
  0x30   :  { %774 = vmatpush3.bf16.msra.mxu1 %v773_v46  ;;  %v827_v46 = vpack.c.bf16 %v379_v44, %v378_v43 }
  0x31   :  { %775 = vmatprep.subr.bf16.mxu1 %v883_v0 }
  0x32   :  { %753 = vmatpush3.bf16.msra.mxu0 %v752_v45  ;;  %v380_v45 = vld [vmem:[#allocation2 + $0x210] sm:$0xff] }
  0x33   :  { %778 = vmatprep.subr.bf16.mxu0 %v883_v0 }
  0x34   :  { %777 = vmatpush3.bf16.msra.mxu1 %v776_v50  ;;  %v383_v50 = vld [vmem:[#allocation2 + $0x228] sm:$0xff] }
  0x35   :  { %588 = vmatmul.mubr.f32.vlgmr.msra.gmra.mrb[0].mxu0 %v25_v47  ;;  %802 = vmatprep.subr.bf16.mxu1 %v883_v0  ;;  %v381_v47 = vld [vmem:[#allocation2 + $0x218] sm:$0xff]  ;;  %v833_v51 = vpack.c.bf16 %v383_v50, %v382_v49 }
  0x36   :  { %657 = vmatprep.mubr.msk.f32.mxu0 %vm884_vm0, %v885_v1  ;;  %780 = vmatpush3.bf16.msra.mxu0 %v779_v54  ;;  %v830_v48 = vpack.c.bf16 %v381_v47, %v380_v45  ;;  %v386_v54 = vld [vmem:[#allocation2 + $0x240] sm:$0xff] }
  0x37   :  { %781 = vmatprep.subr.bf16.mxu0 %v883_v0 }
  0x3a   :  { %783 = vmatpush3.bf16.msra.mxu0 %v782_v56  ;;  %v839_v56 = vpack.c.bf16 %v387_v55, %v386_v54 }
  0x3b   :  { %784 = vmatprep.subr.bf16.mxu0 %v883_v0 }
  0x3e   :  { %786 = vmatpush3.bf16.msra.mxu0 %v785_v59  ;;  %v842_v59 = vpack.c.bf16 %v389_v58, %v388_v57 }
  0x3f   :  { %787 = vmatprep.subr.bf16.mxu0 %v883_v0 }
  0x42   :  { %789 = vmatpush3.bf16.msra.mxu0 %v788_v62  ;;  %v845_v62 = vpack.c.bf16 %v391_v61, %v390_v60 }
  0x43   :  { %790 = vmatprep.subr.bf16.mxu0 %v883_v0 }
  0x46   :  { %792 = vmatpush3.bf16.msra.mxu0 %v791_v3 }
  0x47   :  { %793 = vmatprep.subr.bf16.mxu0 %v883_v0 }
  0x4a   :  { %795 = vmatpush3.bf16.msra.mxu0 %v794_v6  ;;  %v848_v6 = vpack.c.bf16 %v393_v5, %v392_v4 }
  0x4b   :  { %796 = vmatprep.subr.bf16.mxu0 %v883_v0 }
  0x4e   :  { %798 = vmatpush3.bf16.msra.mxu0 %v797_v9 }
  0x4f   :  { %799 = vmatprep.subr.bf16.mxu0 %v883_v0 }
  0x52   :  { %801 = vmatpush3.bf16.msra.mxu0 %v800_v15 }
  0x53   :  { %826 = vmatprep.subr.bf16.mxu0 %v883_v0 }
 0x108   :  { %v108_v10 = vpop.f32.mrb[0].mxu0 }
 0x109   :  { %v112_v11 = vmax.f32 %v108_v10, 0.0  ;;  %v589_v12 = vpop.f32.mrb[1].mxu0 }
 0x10b   :  { %623 = vmatmul.mubr.f32.vlgmr.msra.gmra.mrb[0].mxu1 %v112_v11 }
 0x10c   :  { %692 = vmatprep.mubr.msk.f32.mxu1 %vm884_vm0, %v885_v1  ;;  %804 = vmatpush3.bf16.msra.mxu1 %v803_v19 }
 0x10d   :  { %805 = vmatprep.subr.bf16.mxu1 %v883_v0 }
 0x110   :  { %807 = vmatpush3.bf16.msra.mxu1 %v806_v21 }
 0x111   :  { %808 = vmatprep.subr.bf16.mxu1 %v883_v0 }
 0x114   :  { %810 = vmatpush3.bf16.msra.mxu1 %v809_v24 }
 0x115   :  { %811 = vmatprep.subr.bf16.mxu1 %v883_v0 }
 0x118   :  { %813 = vmatpush3.bf16.msra.mxu1 %v812_v27 }
 0x119   :  { %814 = vmatprep.subr.bf16.mxu1 %v883_v0 }
 0x11c   :  { %816 = vmatpush3.bf16.msra.mxu1 %v815_v30 }
 0x11d   :  { %817 = vmatprep.subr.bf16.mxu1 %v883_v0 }
 0x120   :  { %819 = vmatpush3.bf16.msra.mxu1 %v818_v33 }
 0x121   :  { %820 = vmatprep.subr.bf16.mxu1 %v883_v0 }
 0x124   :  { %822 = vmatpush3.bf16.msra.mxu1 %v821_v36 }
 0x125   :  { %823 = vmatprep.subr.bf16.mxu1 %v883_v0 }
 0x128   :  { %825 = vmatpush3.bf16.msra.mxu1 %v824_v42 }
 0x1de   :  { %v196_v37 = vpop.f32.mrb[0].mxu1 }
 0x1df   :  { %v200_v38 = vmax.f32 %v196_v37, 0.0  ;;  %v624_v39 = vpop.f32.mrb[1].mxu1 }
 0x1e1   :  { %658 = vmatmul.mubr.f32.vlgmr.msra.gmra.mrb[2].mxu0 %v200_v38 }
 0x1e2   :  { %727 = vmatprep.mubr.msk.f32.mxu0 %vm884_vm0, %v885_v1  ;;  %828 = vmatpush3.bf16.msra.mxu0 %v827_v46  ;;  %v384_v1 = vld [vmem:[#allocation2 + $0x230] sm:$0xff] }
 0x1e3   :  { %829 = vmatprep.subr.bf16.mxu0 %v883_v0  ;;  %v836_v53 = vpack.c.bf16 %v385_v52, %v384_v1 }
 0x1e6   :  { %831 = vmatpush3.bf16.msra.mxu0 %v830_v48 }
 0x1e7   :  { %832 = vmatprep.subr.bf16.mxu0 %v883_v0 }
 0x1ea   :  { %834 = vmatpush3.bf16.msra.mxu0 %v833_v51 }
 0x1eb   :  { %835 = vmatprep.subr.bf16.mxu0 %v883_v0 }
 0x1ee   :  { %837 = vmatpush3.bf16.msra.mxu0 %v836_v53 }
 0x1ef   :  { %838 = vmatprep.subr.bf16.mxu0 %v883_v0 }
 0x1f2   :  { %840 = vmatpush3.bf16.msra.mxu0 %v839_v56 }
 0x1f3   :  { %841 = vmatprep.subr.bf16.mxu0 %v883_v0 }
 0x1f6   :  { %843 = vmatpush3.bf16.msra.mxu0 %v842_v59 }
 0x1f7   :  { %844 = vmatprep.subr.bf16.mxu0 %v883_v0 }
 0x1fa   :  { %846 = vmatpush3.bf16.msra.mxu0 %v845_v62 }
 0x1fb   :  { %847 = vmatprep.subr.bf16.mxu0 %v883_v0 }
 0x1fe   :  { %849 = vmatpush3.bf16.msra.mxu0 %v848_v6 }
 0x2b4   :  { %v284_v63 = vpop.f32.mrb[2].mxu0 }
 0x2b5   :  { %v288_v2 = vmax.f32 %v284_v63, 0.0  ;;  %v659_v3 = vpop.f32.mrb[3].mxu0 }
 0x2b7   :  { %693 = vmatmul.mubr.f32.vlgmr.msra.gmra.mrb[2].mxu1 %v288_v2 }
 0x38a   :  { %v372_v7 = vpop.f32.mrb[2].mxu1 }
 0x38b   :  { %v376_v8 = vmax.f32 %v372_v7, 0.0  ;;  %v694_v9 = vpop.f32.mrb[3].mxu1 }
 0x38d   :  { %728 = vmatmul.mubr.f32.vlgmr.msra.gmra.mrb[4].mxu0 %v376_v8 }
 0x460   :  { %v460_v10 = vpop.f32.mrb[4].mxu0 }
 0x461   :  { %464 = vst [vmem:[%s971_s2] sm:$0xff] %v460_v10  ;;  %v729_v11 = vpop.f32.mrb[5].mxu0 }
 0x462   :  { %469 = vsyncpa [#allocation3], 1 }

</bundles_post_ra>
